<compile_context>
chip_gen: v6e
topology: v6e:2x2x1
jax: 0.10.0
libtpu: 0.0.40
codegen_flags: <defaults>
</compile_context>

<pallas_src>
import math

import jax
import jax.numpy as jnp
from jax.experimental import pallas as pl
from jax.experimental.pallas import tpu as pltpu


def autoencoder_kernel(params_ref, x_ref, o_ref):
    # params_ref: SMEM, flat f32 of length 3*F*(F+1); layout [layer, out_j, in_k] with
    #             the bias at in_k == F (i.e. each layer is the [W^T | b] row-major blob).
    # x_ref/o_ref: VMEM (F, TBC, 128) f32 -- batch on both sublane and lane axes (dense).
    f = x_ref.shape[0]
    h = [x_ref[k] for k in range(f)]          # F slabs of (TBC, 128)

    def affine(layer, h, act):
        base = layer * f * (f + 1)
        out = []
        for j in range(f):                    # static unroll: 5 outputs
            row = base + j * (f + 1)
            # bias (scalar splat) + K=5 contraction as unrolled scalar*slab VPU FMAs.
            acc = params_ref[row + f] + params_ref[row] * h[0]
            for k in range(1, f):
                acc = acc + params_ref[row + k] * h[k]
            out.append(act(acc))
        return out

    relu = lambda v: jnp.maximum(v, 0.0)
    # exp and the approximate reciprocal both issue on the EUP slot.
    sigm = lambda v: pl.reciprocal(1.0 + jnp.exp(-v), approx=True)

    h = affine(0, h, relu)                    # encoder Linear(5,5) + ReLU
    h = affine(1, h, relu)                    # fused Linear(5,2)@Linear(2,5) + ReLU
    h = affine(2, h, sigm)                    # decoder Linear(5,5) + Sigmoid
    for j in range(f):
        o_ref[j] = h[j].astype(o_ref.dtype)


def prepare_params(params):
    """Fold the activation-free Linear(5,2)->Linear(2,5) pair and pack everything into
    one flat f32 blob for SMEM.  Call ONCE and reuse across forward calls."""
    (w1, b1), (w2, b2), (w3, b3), (w4, b4) = params
    w23 = w2 @ w3                              # (5, 5), exact (rank-2)
    b23 = b2 @ w3 + b3                         # (5,)

    def pack(w, b):                            # (F_out, F_in + 1) = [W^T | b]
        return jnp.concatenate([w.T, b[:, None]], axis=1)

    packed = jnp.stack([pack(w1, b1), pack(w23, b23), pack(w4, b4)])
    return packed.reshape(-1).astype(jnp.float32)   # (3 * F * (F+1),)


def autoencoder_forward_fm(x_fm, packed_params, *, batch_tile=65536):
    """Feature-major fast path: x_fm is (F, Bc, 128) f32 (batch folded onto the last two
    axes).  Zero wrapper HBM passes; returns the same (F, Bc, 128) layout."""
    f, nbc, lane = x_fm.shape
    assert lane == 128

    # Tile selection: big tiles to amortize the ~0.35us/step overhead, multiple-of-8
    # sublane blocks, and >=2 grid steps when the batch allows it (v7x megacore).
    target = max(1, min(batch_tile // 128, nbc))
    if nbc >= 16:
        tbc = min(target, pl.cdiv(nbc, 2))
        tbc = max(8, (tbc // 8) * 8)
    else:
        tbc = nbc                               # single block over a small batch
    grid = (pl.cdiv(nbc, tbc),)

    bp = nbc * 128
    cost = pl.CostEstimate(
        flops=2 * bp * f * f * 3,
        transcendentals=2 * bp * f,             # exp + approx reciprocal
        bytes_accessed=(2 * f * bp + int(packed_params.size)) * 4,
    )

    return pl.pallas_call(
        autoencoder_kernel,
        out_shape=jax.ShapeDtypeStruct((f, nbc, 128), jnp.float32),
        grid=grid,
        in_specs=[
            # tiny parameter blob: whole array, resident in SMEM (scalar splats in-kernel)
            pl.BlockSpec(memory_space=pltpu.MemorySpace.SMEM),
            # batch tile: dense (sublane, lane) = (tbc, 128)
            pl.BlockSpec((f, tbc, 128), lambda i: (0, i, 0)),
        ],
        out_specs=pl.BlockSpec((f, tbc, 128), lambda i: (0, i, 0)),
        compiler_params=pltpu.CompilerParams(dimension_semantics=("parallel",)),
        cost_estimate=cost,
    )(packed_params, x_fm)


def autoencoder_forward(x, packed_params, *, batch_tile=65536):
    """(B, 5) -> (B, 5) interface matching the PyTorch module.  Does exactly one fused
    pad+transpose copy in and one slice+transpose copy out; callers that can keep
    activations feature-major should use autoencoder_forward_fm directly."""
    b_sz, f = x.shape
    bp = ((b_sz + 127) // 128) * 128
    x_fm = jnp.pad(x.astype(jnp.float32).T, ((0, 0), (0, bp - b_sz)))   # (F, BP)
    x_fm = x_fm.reshape(f, bp // 128, 128)                              # free reshape
    out_fm = autoencoder_forward_fm(x_fm, packed_params, batch_tile=batch_tile)
    # Only the first b_sz columns are valid (pad columns may hold garbage) -> slice.
    return out_fm.reshape(f, bp)[:, :b_sz].T


def init_linear(key, in_features, out_features):
    """Deterministic init mimicking PyTorch nn.Linear default (uniform +-1/sqrt(in)).
    Weight returned pre-transposed as (in_features, out_features); bias as (out,)."""
    kw, kb = jax.random.split(key)
    bound = 1.0 / math.sqrt(in_features)
    w = jax.random.uniform(kw, (in_features, out_features), jnp.float32,
                           minval=-bound, maxval=bound)
    b = jax.random.uniform(kb, (out_features,), jnp.float32,
                           minval=-bound, maxval=bound)
    return w, b


def reference_forward(x, params):
    """Pure-JAX reference with the ORIGINAL (unfused) layer structure."""
    (w1, b1), (w2, b2), (w3, b3), (w4, b4) = params
    h = jnp.maximum(x @ w1 + b1, 0.0)
    z = h @ w2 + b2
    h = jnp.maximum(z @ w3 + b3, 0.0)
    return jax.nn.sigmoid(h @ w4 + b4)


if __name__ == "__main__":
    key = jax.random.PRNGKey(0)
    k_x, k1, k2, k3, k4 = jax.random.split(key, 5)

    B = 8
    x = jax.random.normal(k_x, (B, 5), jnp.float32)

    params = (
        init_linear(k1, 5, 5),   # encoder Linear(5, 5)
        init_linear(k2, 5, 2),   # encoder Linear(5, 2)
        init_linear(k3, 2, 5),   # decoder Linear(2, 5)
        init_linear(k4, 5, 5),   # decoder Linear(5, 5)
    )

    packed = prepare_params(params)            # hoisted out of the forward path
    out = autoencoder_forward(x, packed)
    out = jax.block_until_ready(out)

    ref = reference_forward(x, params)
    assert out.shape == (B, 5)
    # Tolerance-based check: the exact W2@W3 fold changes f32 rounding order and the
    # sigmoid uses the approximate EUP reciprocal, so we don't expect bit-exactness.
    assert jnp.allclose(out, ref, atol=2e-3, rtol=2e-3), "mismatch vs JAX reference"

    print("KERNEL_OK")
</pallas_src>

<mosaic_0001>
module attributes {stable_mosaic.version = 11 : i64} {
  func.func @autoencoder_kernel(%arg0: i32, %arg1: memref<90xf32, #tpu.memory_space<smem>>, %arg2: memref<5x1x128xf32, #tpu.memory_space<vmem>>, %arg3: memref<5x1x128xf32, #tpu.memory_space<vmem>>) attributes {dimension_semantics = [#tpu.dimension_semantics<parallel>], iteration_bounds = array<i64: 1>, scalar_prefetch = 0 : i64, scratch_operands = 0 : i64, tpu.core_type = #tpu.core_type<tc>, window_params = [{transform_indices = @transform_0, window_bounds = array<i64: 90>}, {transform_indices = @transform_1, window_bounds = array<i64: 5, 1, 128>}, {transform_indices = @transform_2, window_bounds = array<i64: 5, 1, 128>}]} {
    %c0 = arith.constant 0 : index
    %c0_0 = arith.constant 0 : index
    %c0_1 = arith.constant 0 : index
    %0 = vector.load %arg2[%c0, %c0_0, %c0_1] : memref<5x1x128xf32, #tpu.memory_space<vmem>>, vector<1x1x128xf32>
    %1 = vector.shape_cast %0 : vector<1x1x128xf32> to vector<1x128xf32>
    %c1 = arith.constant 1 : index
    %c0_2 = arith.constant 0 : index
    %c0_3 = arith.constant 0 : index
    %2 = vector.load %arg2[%c1, %c0_2, %c0_3] : memref<5x1x128xf32, #tpu.memory_space<vmem>>, vector<1x1x128xf32>
    %3 = vector.shape_cast %2 : vector<1x1x128xf32> to vector<1x128xf32>
    %c2 = arith.constant 2 : index
    %c0_4 = arith.constant 0 : index
    %c0_5 = arith.constant 0 : index
    %4 = vector.load %arg2[%c2, %c0_4, %c0_5] : memref<5x1x128xf32, #tpu.memory_space<vmem>>, vector<1x1x128xf32>
    %5 = vector.shape_cast %4 : vector<1x1x128xf32> to vector<1x128xf32>
    %c3 = arith.constant 3 : index
    %c0_6 = arith.constant 0 : index
    %c0_7 = arith.constant 0 : index
    %6 = vector.load %arg2[%c3, %c0_6, %c0_7] : memref<5x1x128xf32, #tpu.memory_space<vmem>>, vector<1x1x128xf32>
    %7 = vector.shape_cast %6 : vector<1x1x128xf32> to vector<1x128xf32>
    %c4 = arith.constant 4 : index
    %c0_8 = arith.constant 0 : index
    %c0_9 = arith.constant 0 : index
    %8 = vector.load %arg2[%c4, %c0_8, %c0_9] : memref<5x1x128xf32, #tpu.memory_space<vmem>>, vector<1x1x128xf32>
    %9 = vector.shape_cast %8 : vector<1x1x128xf32> to vector<1x128xf32>
    %c5 = arith.constant 5 : index
    %10 = memref.load %arg1[%c5] : memref<90xf32, #tpu.memory_space<smem>>
    %c0_10 = arith.constant 0 : index
    %11 = memref.load %arg1[%c0_10] : memref<90xf32, #tpu.memory_space<smem>>
    %12 = vector.broadcast %11 : f32 to vector<1x128xf32>
    %13 = arith.mulf %12, %1 : vector<1x128xf32>
    %14 = vector.broadcast %10 : f32 to vector<1x128xf32>
    %15 = arith.addf %14, %13 : vector<1x128xf32>
    %c1_11 = arith.constant 1 : index
    %16 = memref.load %arg1[%c1_11] : memref<90xf32, #tpu.memory_space<smem>>
    %17 = vector.broadcast %16 : f32 to vector<1x128xf32>
    %18 = arith.mulf %17, %3 : vector<1x128xf32>
    %19 = arith.addf %15, %18 : vector<1x128xf32>
    %c2_12 = arith.constant 2 : index
    %20 = memref.load %arg1[%c2_12] : memref<90xf32, #tpu.memory_space<smem>>
    %21 = vector.broadcast %20 : f32 to vector<1x128xf32>
    %22 = arith.mulf %21, %5 : vector<1x128xf32>
    %23 = arith.addf %19, %22 : vector<1x128xf32>
    %c3_13 = arith.constant 3 : index
    %24 = memref.load %arg1[%c3_13] : memref<90xf32, #tpu.memory_space<smem>>
    %25 = vector.broadcast %24 : f32 to vector<1x128xf32>
    %26 = arith.mulf %25, %7 : vector<1x128xf32>
    %27 = arith.addf %23, %26 : vector<1x128xf32>
    %c4_14 = arith.constant 4 : index
    %28 = memref.load %arg1[%c4_14] : memref<90xf32, #tpu.memory_space<smem>>
    %29 = vector.broadcast %28 : f32 to vector<1x128xf32>
    %30 = arith.mulf %29, %9 : vector<1x128xf32>
    %31 = arith.addf %27, %30 : vector<1x128xf32>
    %cst = arith.constant 0.000000e+00 : f32
    %32 = vector.broadcast %cst : f32 to vector<1x128xf32>
    %33 = arith.maximumf %31, %32 : vector<1x128xf32>
    %c11 = arith.constant 11 : index
    %34 = memref.load %arg1[%c11] : memref<90xf32, #tpu.memory_space<smem>>
    %c6 = arith.constant 6 : index
    %35 = memref.load %arg1[%c6] : memref<90xf32, #tpu.memory_space<smem>>
    %36 = vector.broadcast %35 : f32 to vector<1x128xf32>
    %37 = arith.mulf %36, %1 : vector<1x128xf32>
    %38 = vector.broadcast %34 : f32 to vector<1x128xf32>
    %39 = arith.addf %38, %37 : vector<1x128xf32>
    %c7 = arith.constant 7 : index
    %40 = memref.load %arg1[%c7] : memref<90xf32, #tpu.memory_space<smem>>
    %41 = vector.broadcast %40 : f32 to vector<1x128xf32>
    %42 = arith.mulf %41, %3 : vector<1x128xf32>
    %43 = arith.addf %39, %42 : vector<1x128xf32>
    %c8 = arith.constant 8 : index
    %44 = memref.load %arg1[%c8] : memref<90xf32, #tpu.memory_space<smem>>
    %45 = vector.broadcast %44 : f32 to vector<1x128xf32>
    %46 = arith.mulf %45, %5 : vector<1x128xf32>
    %47 = arith.addf %43, %46 : vector<1x128xf32>
    %c9 = arith.constant 9 : index
    %48 = memref.load %arg1[%c9] : memref<90xf32, #tpu.memory_space<smem>>
    %49 = vector.broadcast %48 : f32 to vector<1x128xf32>
    %50 = arith.mulf %49, %7 : vector<1x128xf32>
    %51 = arith.addf %47, %50 : vector<1x128xf32>
    %c10 = arith.constant 10 : index
    %52 = memref.load %arg1[%c10] : memref<90xf32, #tpu.memory_space<smem>>
    %53 = vector.broadcast %52 : f32 to vector<1x128xf32>
    %54 = arith.mulf %53, %9 : vector<1x128xf32>
    %55 = arith.addf %51, %54 : vector<1x128xf32>
    %cst_15 = arith.constant 0.000000e+00 : f32
    %56 = vector.broadcast %cst_15 : f32 to vector<1x128xf32>
    %57 = arith.maximumf %55, %56 : vector<1x128xf32>
    %c17 = arith.constant 17 : index
    %58 = memref.load %arg1[%c17] : memref<90xf32, #tpu.memory_space<smem>>
    %c12 = arith.constant 12 : index
    %59 = memref.load %arg1[%c12] : memref<90xf32, #tpu.memory_space<smem>>
    %60 = vector.broadcast %59 : f32 to vector<1x128xf32>
    %61 = arith.mulf %60, %1 : vector<1x128xf32>
    %62 = vector.broadcast %58 : f32 to vector<1x128xf32>
    %63 = arith.addf %62, %61 : vector<1x128xf32>
    %c13 = arith.constant 13 : index
    %64 = memref.load %arg1[%c13] : memref<90xf32, #tpu.memory_space<smem>>
    %65 = vector.broadcast %64 : f32 to vector<1x128xf32>
    %66 = arith.mulf %65, %3 : vector<1x128xf32>
    %67 = arith.addf %63, %66 : vector<1x128xf32>
    %c14 = arith.constant 14 : index
    %68 = memref.load %arg1[%c14] : memref<90xf32, #tpu.memory_space<smem>>
    %69 = vector.broadcast %68 : f32 to vector<1x128xf32>
    %70 = arith.mulf %69, %5 : vector<1x128xf32>
    %71 = arith.addf %67, %70 : vector<1x128xf32>
    %c15 = arith.constant 15 : index
    %72 = memref.load %arg1[%c15] : memref<90xf32, #tpu.memory_space<smem>>
    %73 = vector.broadcast %72 : f32 to vector<1x128xf32>
    %74 = arith.mulf %73, %7 : vector<1x128xf32>
    %75 = arith.addf %71, %74 : vector<1x128xf32>
    %c16 = arith.constant 16 : index
    %76 = memref.load %arg1[%c16] : memref<90xf32, #tpu.memory_space<smem>>
    %77 = vector.broadcast %76 : f32 to vector<1x128xf32>
    %78 = arith.mulf %77, %9 : vector<1x128xf32>
    %79 = arith.addf %75, %78 : vector<1x128xf32>
    %cst_16 = arith.constant 0.000000e+00 : f32
    %80 = vector.broadcast %cst_16 : f32 to vector<1x128xf32>
    %81 = arith.maximumf %79, %80 : vector<1x128xf32>
    %c23 = arith.constant 23 : index
    %82 = memref.load %arg1[%c23] : memref<90xf32, #tpu.memory_space<smem>>
    %c18 = arith.constant 18 : index
    %83 = memref.load %arg1[%c18] : memref<90xf32, #tpu.memory_space<smem>>
    %84 = vector.broadcast %83 : f32 to vector<1x128xf32>
    %85 = arith.mulf %84, %1 : vector<1x128xf32>
    %86 = vector.broadcast %82 : f32 to vector<1x128xf32>
    %87 = arith.addf %86, %85 : vector<1x128xf32>
    %c19 = arith.constant 19 : index
    %88 = memref.load %arg1[%c19] : memref<90xf32, #tpu.memory_space<smem>>
    %89 = vector.broadcast %88 : f32 to vector<1x128xf32>
    %90 = arith.mulf %89, %3 : vector<1x128xf32>
    %91 = arith.addf %87, %90 : vector<1x128xf32>
    %c20 = arith.constant 20 : index
    %92 = memref.load %arg1[%c20] : memref<90xf32, #tpu.memory_space<smem>>
    %93 = vector.broadcast %92 : f32 to vector<1x128xf32>
    %94 = arith.mulf %93, %5 : vector<1x128xf32>
    %95 = arith.addf %91, %94 : vector<1x128xf32>
    %c21 = arith.constant 21 : index
    %96 = memref.load %arg1[%c21] : memref<90xf32, #tpu.memory_space<smem>>
    %97 = vector.broadcast %96 : f32 to vector<1x128xf32>
    %98 = arith.mulf %97, %7 : vector<1x128xf32>
    %99 = arith.addf %95, %98 : vector<1x128xf32>
    %c22 = arith.constant 22 : index
    %100 = memref.load %arg1[%c22] : memref<90xf32, #tpu.memory_space<smem>>
    %101 = vector.broadcast %100 : f32 to vector<1x128xf32>
    %102 = arith.mulf %101, %9 : vector<1x128xf32>
    %103 = arith.addf %99, %102 : vector<1x128xf32>
    %cst_17 = arith.constant 0.000000e+00 : f32
    %104 = vector.broadcast %cst_17 : f32 to vector<1x128xf32>
    %105 = arith.maximumf %103, %104 : vector<1x128xf32>
    %c29 = arith.constant 29 : index
    %106 = memref.load %arg1[%c29] : memref<90xf32, #tpu.memory_space<smem>>
    %c24 = arith.constant 24 : index
    %107 = memref.load %arg1[%c24] : memref<90xf32, #tpu.memory_space<smem>>
    %108 = vector.broadcast %107 : f32 to vector<1x128xf32>
    %109 = arith.mulf %108, %1 : vector<1x128xf32>
    %110 = vector.broadcast %106 : f32 to vector<1x128xf32>
    %111 = arith.addf %110, %109 : vector<1x128xf32>
    %c25 = arith.constant 25 : index
    %112 = memref.load %arg1[%c25] : memref<90xf32, #tpu.memory_space<smem>>
    %113 = vector.broadcast %112 : f32 to vector<1x128xf32>
    %114 = arith.mulf %113, %3 : vector<1x128xf32>
    %115 = arith.addf %111, %114 : vector<1x128xf32>
    %c26 = arith.constant 26 : index
    %116 = memref.load %arg1[%c26] : memref<90xf32, #tpu.memory_space<smem>>
    %117 = vector.broadcast %116 : f32 to vector<1x128xf32>
    %118 = arith.mulf %117, %5 : vector<1x128xf32>
    %119 = arith.addf %115, %118 : vector<1x128xf32>
    %c27 = arith.constant 27 : index
    %120 = memref.load %arg1[%c27] : memref<90xf32, #tpu.memory_space<smem>>
    %121 = vector.broadcast %120 : f32 to vector<1x128xf32>
    %122 = arith.mulf %121, %7 : vector<1x128xf32>
    %123 = arith.addf %119, %122 : vector<1x128xf32>
    %c28 = arith.constant 28 : index
    %124 = memref.load %arg1[%c28] : memref<90xf32, #tpu.memory_space<smem>>
    %125 = vector.broadcast %124 : f32 to vector<1x128xf32>
    %126 = arith.mulf %125, %9 : vector<1x128xf32>
    %127 = arith.addf %123, %126 : vector<1x128xf32>
    %cst_18 = arith.constant 0.000000e+00 : f32
    %128 = vector.broadcast %cst_18 : f32 to vector<1x128xf32>
    %129 = arith.maximumf %127, %128 : vector<1x128xf32>
    %c35 = arith.constant 35 : index
    %130 = memref.load %arg1[%c35] : memref<90xf32, #tpu.memory_space<smem>>
    %c30 = arith.constant 30 : index
    %131 = memref.load %arg1[%c30] : memref<90xf32, #tpu.memory_space<smem>>
    %132 = vector.broadcast %131 : f32 to vector<1x128xf32>
    %133 = arith.mulf %132, %33 : vector<1x128xf32>
    %134 = vector.broadcast %130 : f32 to vector<1x128xf32>
    %135 = arith.addf %134, %133 : vector<1x128xf32>
    %c31 = arith.constant 31 : index
    %136 = memref.load %arg1[%c31] : memref<90xf32, #tpu.memory_space<smem>>
    %137 = vector.broadcast %136 : f32 to vector<1x128xf32>
    %138 = arith.mulf %137, %57 : vector<1x128xf32>
    %139 = arith.addf %135, %138 : vector<1x128xf32>
    %c32 = arith.constant 32 : index
    %140 = memref.load %arg1[%c32] : memref<90xf32, #tpu.memory_space<smem>>
    %141 = vector.broadcast %140 : f32 to vector<1x128xf32>
    %142 = arith.mulf %141, %81 : vector<1x128xf32>
    %143 = arith.addf %139, %142 : vector<1x128xf32>
    %c33 = arith.constant 33 : index
    %144 = memref.load %arg1[%c33] : memref<90xf32, #tpu.memory_space<smem>>
    %145 = vector.broadcast %144 : f32 to vector<1x128xf32>
    %146 = arith.mulf %145, %105 : vector<1x128xf32>
    %147 = arith.addf %143, %146 : vector<1x128xf32>
    %c34 = arith.constant 34 : index
    %148 = memref.load %arg1[%c34] : memref<90xf32, #tpu.memory_space<smem>>
    %149 = vector.broadcast %148 : f32 to vector<1x128xf32>
    %150 = arith.mulf %149, %129 : vector<1x128xf32>
    %151 = arith.addf %147, %150 : vector<1x128xf32>
    %cst_19 = arith.constant 0.000000e+00 : f32
    %152 = vector.broadcast %cst_19 : f32 to vector<1x128xf32>
    %153 = arith.maximumf %151, %152 : vector<1x128xf32>
    %c41 = arith.constant 41 : index
    %154 = memref.load %arg1[%c41] : memref<90xf32, #tpu.memory_space<smem>>
    %c36 = arith.constant 36 : index
    %155 = memref.load %arg1[%c36] : memref<90xf32, #tpu.memory_space<smem>>
    %156 = vector.broadcast %155 : f32 to vector<1x128xf32>
    %157 = arith.mulf %156, %33 : vector<1x128xf32>
    %158 = vector.broadcast %154 : f32 to vector<1x128xf32>
    %159 = arith.addf %158, %157 : vector<1x128xf32>
    %c37 = arith.constant 37 : index
    %160 = memref.load %arg1[%c37] : memref<90xf32, #tpu.memory_space<smem>>
    %161 = vector.broadcast %160 : f32 to vector<1x128xf32>
    %162 = arith.mulf %161, %57 : vector<1x128xf32>
    %163 = arith.addf %159, %162 : vector<1x128xf32>
    %c38 = arith.constant 38 : index
    %164 = memref.load %arg1[%c38] : memref<90xf32, #tpu.memory_space<smem>>
    %165 = vector.broadcast %164 : f32 to vector<1x128xf32>
    %166 = arith.mulf %165, %81 : vector<1x128xf32>
    %167 = arith.addf %163, %166 : vector<1x128xf32>
    %c39 = arith.constant 39 : index
    %168 = memref.load %arg1[%c39] : memref<90xf32, #tpu.memory_space<smem>>
    %169 = vector.broadcast %168 : f32 to vector<1x128xf32>
    %170 = arith.mulf %169, %105 : vector<1x128xf32>
    %171 = arith.addf %167, %170 : vector<1x128xf32>
    %c40 = arith.constant 40 : index
    %172 = memref.load %arg1[%c40] : memref<90xf32, #tpu.memory_space<smem>>
    %173 = vector.broadcast %172 : f32 to vector<1x128xf32>
    %174 = arith.mulf %173, %129 : vector<1x128xf32>
    %175 = arith.addf %171, %174 : vector<1x128xf32>
    %cst_20 = arith.constant 0.000000e+00 : f32
    %176 = vector.broadcast %cst_20 : f32 to vector<1x128xf32>
    %177 = arith.maximumf %175, %176 : vector<1x128xf32>
    %c47 = arith.constant 47 : index
    %178 = memref.load %arg1[%c47] : memref<90xf32, #tpu.memory_space<smem>>
    %c42 = arith.constant 42 : index
    %179 = memref.load %arg1[%c42] : memref<90xf32, #tpu.memory_space<smem>>
    %180 = vector.broadcast %179 : f32 to vector<1x128xf32>
    %181 = arith.mulf %180, %33 : vector<1x128xf32>
    %182 = vector.broadcast %178 : f32 to vector<1x128xf32>
    %183 = arith.addf %182, %181 : vector<1x128xf32>
    %c43 = arith.constant 43 : index
    %184 = memref.load %arg1[%c43] : memref<90xf32, #tpu.memory_space<smem>>
    %185 = vector.broadcast %184 : f32 to vector<1x128xf32>
    %186 = arith.mulf %185, %57 : vector<1x128xf32>
    %187 = arith.addf %183, %186 : vector<1x128xf32>
    %c44 = arith.constant 44 : index
    %188 = memref.load %arg1[%c44] : memref<90xf32, #tpu.memory_space<smem>>
    %189 = vector.broadcast %188 : f32 to vector<1x128xf32>
    %190 = arith.mulf %189, %81 : vector<1x128xf32>
    %191 = arith.addf %187, %190 : vector<1x128xf32>
    %c45 = arith.constant 45 : index
    %192 = memref.load %arg1[%c45] : memref<90xf32, #tpu.memory_space<smem>>
    %193 = vector.broadcast %192 : f32 to vector<1x128xf32>
    %194 = arith.mulf %193, %105 : vector<1x128xf32>
    %195 = arith.addf %191, %194 : vector<1x128xf32>
    %c46 = arith.constant 46 : index
    %196 = memref.load %arg1[%c46] : memref<90xf32, #tpu.memory_space<smem>>
    %197 = vector.broadcast %196 : f32 to vector<1x128xf32>
    %198 = arith.mulf %197, %129 : vector<1x128xf32>
    %199 = arith.addf %195, %198 : vector<1x128xf32>
    %cst_21 = arith.constant 0.000000e+00 : f32
    %200 = vector.broadcast %cst_21 : f32 to vector<1x128xf32>
    %201 = arith.maximumf %199, %200 : vector<1x128xf32>
    %c53 = arith.constant 53 : index
    %202 = memref.load %arg1[%c53] : memref<90xf32, #tpu.memory_space<smem>>
    %c48 = arith.constant 48 : index
    %203 = memref.load %arg1[%c48] : memref<90xf32, #tpu.memory_space<smem>>
    %204 = vector.broadcast %203 : f32 to vector<1x128xf32>
    %205 = arith.mulf %204, %33 : vector<1x128xf32>
    %206 = vector.broadcast %202 : f32 to vector<1x128xf32>
    %207 = arith.addf %206, %205 : vector<1x128xf32>
    %c49 = arith.constant 49 : index
    %208 = memref.load %arg1[%c49] : memref<90xf32, #tpu.memory_space<smem>>
    %209 = vector.broadcast %208 : f32 to vector<1x128xf32>
    %210 = arith.mulf %209, %57 : vector<1x128xf32>
    %211 = arith.addf %207, %210 : vector<1x128xf32>
    %c50 = arith.constant 50 : index
    %212 = memref.load %arg1[%c50] : memref<90xf32, #tpu.memory_space<smem>>
    %213 = vector.broadcast %212 : f32 to vector<1x128xf32>
    %214 = arith.mulf %213, %81 : vector<1x128xf32>
    %215 = arith.addf %211, %214 : vector<1x128xf32>
    %c51 = arith.constant 51 : index
    %216 = memref.load %arg1[%c51] : memref<90xf32, #tpu.memory_space<smem>>
    %217 = vector.broadcast %216 : f32 to vector<1x128xf32>
    %218 = arith.mulf %217, %105 : vector<1x128xf32>
    %219 = arith.addf %215, %218 : vector<1x128xf32>
    %c52 = arith.constant 52 : index
    %220 = memref.load %arg1[%c52] : memref<90xf32, #tpu.memory_space<smem>>
    %221 = vector.broadcast %220 : f32 to vector<1x128xf32>
    %222 = arith.mulf %221, %129 : vector<1x128xf32>
    %223 = arith.addf %219, %222 : vector<1x128xf32>
    %cst_22 = arith.constant 0.000000e+00 : f32
    %224 = vector.broadcast %cst_22 : f32 to vector<1x128xf32>
    %225 = arith.maximumf %223, %224 : vector<1x128xf32>
    %c59 = arith.constant 59 : index
    %226 = memref.load %arg1[%c59] : memref<90xf32, #tpu.memory_space<smem>>
    %c54 = arith.constant 54 : index
    %227 = memref.load %arg1[%c54] : memref<90xf32, #tpu.memory_space<smem>>
    %228 = vector.broadcast %227 : f32 to vector<1x128xf32>
    %229 = arith.mulf %228, %33 : vector<1x128xf32>
    %230 = vector.broadcast %226 : f32 to vector<1x128xf32>
    %231 = arith.addf %230, %229 : vector<1x128xf32>
    %c55 = arith.constant 55 : index
    %232 = memref.load %arg1[%c55] : memref<90xf32, #tpu.memory_space<smem>>
    %233 = vector.broadcast %232 : f32 to vector<1x128xf32>
    %234 = arith.mulf %233, %57 : vector<1x128xf32>
    %235 = arith.addf %231, %234 : vector<1x128xf32>
    %c56 = arith.constant 56 : index
    %236 = memref.load %arg1[%c56] : memref<90xf32, #tpu.memory_space<smem>>
    %237 = vector.broadcast %236 : f32 to vector<1x128xf32>
    %238 = arith.mulf %237, %81 : vector<1x128xf32>
    %239 = arith.addf %235, %238 : vector<1x128xf32>
    %c57 = arith.constant 57 : index
    %240 = memref.load %arg1[%c57] : memref<90xf32, #tpu.memory_space<smem>>
    %241 = vector.broadcast %240 : f32 to vector<1x128xf32>
    %242 = arith.mulf %241, %105 : vector<1x128xf32>
    %243 = arith.addf %239, %242 : vector<1x128xf32>
    %c58 = arith.constant 58 : index
    %244 = memref.load %arg1[%c58] : memref<90xf32, #tpu.memory_space<smem>>
    %245 = vector.broadcast %244 : f32 to vector<1x128xf32>
    %246 = arith.mulf %245, %129 : vector<1x128xf32>
    %247 = arith.addf %243, %246 : vector<1x128xf32>
    %cst_23 = arith.constant 0.000000e+00 : f32
    %248 = vector.broadcast %cst_23 : f32 to vector<1x128xf32>
    %249 = arith.maximumf %247, %248 : vector<1x128xf32>
    %c65 = arith.constant 65 : index
    %250 = memref.load %arg1[%c65] : memref<90xf32, #tpu.memory_space<smem>>
    %c60 = arith.constant 60 : index
    %251 = memref.load %arg1[%c60] : memref<90xf32, #tpu.memory_space<smem>>
    %252 = vector.broadcast %251 : f32 to vector<1x128xf32>
    %253 = arith.mulf %252, %153 : vector<1x128xf32>
    %254 = vector.broadcast %250 : f32 to vector<1x128xf32>
    %255 = arith.addf %254, %253 : vector<1x128xf32>
    %c61 = arith.constant 61 : index
    %256 = memref.load %arg1[%c61] : memref<90xf32, #tpu.memory_space<smem>>
    %257 = vector.broadcast %256 : f32 to vector<1x128xf32>
    %258 = arith.mulf %257, %177 : vector<1x128xf32>
    %259 = arith.addf %255, %258 : vector<1x128xf32>
    %c62 = arith.constant 62 : index
    %260 = memref.load %arg1[%c62] : memref<90xf32, #tpu.memory_space<smem>>
    %261 = vector.broadcast %260 : f32 to vector<1x128xf32>
    %262 = arith.mulf %261, %201 : vector<1x128xf32>
    %263 = arith.addf %259, %262 : vector<1x128xf32>
    %c63 = arith.constant 63 : index
    %264 = memref.load %arg1[%c63] : memref<90xf32, #tpu.memory_space<smem>>
    %265 = vector.broadcast %264 : f32 to vector<1x128xf32>
    %266 = arith.mulf %265, %225 : vector<1x128xf32>
    %267 = arith.addf %263, %266 : vector<1x128xf32>
    %c64 = arith.constant 64 : index
    %268 = memref.load %arg1[%c64] : memref<90xf32, #tpu.memory_space<smem>>
    %269 = vector.broadcast %268 : f32 to vector<1x128xf32>
    %270 = arith.mulf %269, %249 : vector<1x128xf32>
    %271 = arith.addf %267, %270 : vector<1x128xf32>
    %cst_24 = arith.constant 0.000000e+00 : f32
    %272 = vector.broadcast %cst_24 : f32 to vector<1x128xf32>
    %273 = arith.subf %272, %271 : vector<1x128xf32>
    %274 = math.exp %273 : vector<1x128xf32>
    %cst_25 = arith.constant 1.000000e+00 : f32
    %275 = vector.broadcast %cst_25 : f32 to vector<1x128xf32>
    %276 = arith.addf %275, %274 : vector<1x128xf32>
    %277 = tpu.reciprocal %276 {approx = true} : vector<1x128xf32> -> vector<1x128xf32>
    %c71 = arith.constant 71 : index
    %278 = memref.load %arg1[%c71] : memref<90xf32, #tpu.memory_space<smem>>
    %c66 = arith.constant 66 : index
    %279 = memref.load %arg1[%c66] : memref<90xf32, #tpu.memory_space<smem>>
    %280 = vector.broadcast %279 : f32 to vector<1x128xf32>
    %281 = arith.mulf %280, %153 : vector<1x128xf32>
    %282 = vector.broadcast %278 : f32 to vector<1x128xf32>
    %283 = arith.addf %282, %281 : vector<1x128xf32>
    %c67 = arith.constant 67 : index
    %284 = memref.load %arg1[%c67] : memref<90xf32, #tpu.memory_space<smem>>
    %285 = vector.broadcast %284 : f32 to vector<1x128xf32>
    %286 = arith.mulf %285, %177 : vector<1x128xf32>
    %287 = arith.addf %283, %286 : vector<1x128xf32>
    %c68 = arith.constant 68 : index
    %288 = memref.load %arg1[%c68] : memref<90xf32, #tpu.memory_space<smem>>
    %289 = vector.broadcast %288 : f32 to vector<1x128xf32>
    %290 = arith.mulf %289, %201 : vector<1x128xf32>
    %291 = arith.addf %287, %290 : vector<1x128xf32>
    %c69 = arith.constant 69 : index
    %292 = memref.load %arg1[%c69] : memref<90xf32, #tpu.memory_space<smem>>
    %293 = vector.broadcast %292 : f32 to vector<1x128xf32>
    %294 = arith.mulf %293, %225 : vector<1x128xf32>
    %295 = arith.addf %291, %294 : vector<1x128xf32>
    %c70 = arith.constant 70 : index
    %296 = memref.load %arg1[%c70] : memref<90xf32, #tpu.memory_space<smem>>
    %297 = vector.broadcast %296 : f32 to vector<1x128xf32>
    %298 = arith.mulf %297, %249 : vector<1x128xf32>
    %299 = arith.addf %295, %298 : vector<1x128xf32>
    %cst_26 = arith.constant 0.000000e+00 : f32
    %300 = vector.broadcast %cst_26 : f32 to vector<1x128xf32>
    %301 = arith.subf %300, %299 : vector<1x128xf32>
    %302 = math.exp %301 : vector<1x128xf32>
    %cst_27 = arith.constant 1.000000e+00 : f32
    %303 = vector.broadcast %cst_27 : f32 to vector<1x128xf32>
    %304 = arith.addf %303, %302 : vector<1x128xf32>
    %305 = tpu.reciprocal %304 {approx = true} : vector<1x128xf32> -> vector<1x128xf32>
    %c77 = arith.constant 77 : index
    %306 = memref.load %arg1[%c77] : memref<90xf32, #tpu.memory_space<smem>>
    %c72 = arith.constant 72 : index
    %307 = memref.load %arg1[%c72] : memref<90xf32, #tpu.memory_space<smem>>
    %308 = vector.broadcast %307 : f32 to vector<1x128xf32>
    %309 = arith.mulf %308, %153 : vector<1x128xf32>
    %310 = vector.broadcast %306 : f32 to vector<1x128xf32>
    %311 = arith.addf %310, %309 : vector<1x128xf32>
    %c73 = arith.constant 73 : index
    %312 = memref.load %arg1[%c73] : memref<90xf32, #tpu.memory_space<smem>>
    %313 = vector.broadcast %312 : f32 to vector<1x128xf32>
    %314 = arith.mulf %313, %177 : vector<1x128xf32>
    %315 = arith.addf %311, %314 : vector<1x128xf32>
    %c74 = arith.constant 74 : index
    %316 = memref.load %arg1[%c74] : memref<90xf32, #tpu.memory_space<smem>>
    %317 = vector.broadcast %316 : f32 to vector<1x128xf32>
    %318 = arith.mulf %317, %201 : vector<1x128xf32>
    %319 = arith.addf %315, %318 : vector<1x128xf32>
    %c75 = arith.constant 75 : index
    %320 = memref.load %arg1[%c75] : memref<90xf32, #tpu.memory_space<smem>>
    %321 = vector.broadcast %320 : f32 to vector<1x128xf32>
    %322 = arith.mulf %321, %225 : vector<1x128xf32>
    %323 = arith.addf %319, %322 : vector<1x128xf32>
    %c76 = arith.constant 76 : index
    %324 = memref.load %arg1[%c76] : memref<90xf32, #tpu.memory_space<smem>>
    %325 = vector.broadcast %324 : f32 to vector<1x128xf32>
    %326 = arith.mulf %325, %249 : vector<1x128xf32>
    %327 = arith.addf %323, %326 : vector<1x128xf32>
    %cst_28 = arith.constant 0.000000e+00 : f32
    %328 = vector.broadcast %cst_28 : f32 to vector<1x128xf32>
    %329 = arith.subf %328, %327 : vector<1x128xf32>
    %330 = math.exp %329 : vector<1x128xf32>
    %cst_29 = arith.constant 1.000000e+00 : f32
    %331 = vector.broadcast %cst_29 : f32 to vector<1x128xf32>
    %332 = arith.addf %331, %330 : vector<1x128xf32>
    %333 = tpu.reciprocal %332 {approx = true} : vector<1x128xf32> -> vector<1x128xf32>
    %c83 = arith.constant 83 : index
    %334 = memref.load %arg1[%c83] : memref<90xf32, #tpu.memory_space<smem>>
    %c78 = arith.constant 78 : index
    %335 = memref.load %arg1[%c78] : memref<90xf32, #tpu.memory_space<smem>>
    %336 = vector.broadcast %335 : f32 to vector<1x128xf32>
    %337 = arith.mulf %336, %153 : vector<1x128xf32>
    %338 = vector.broadcast %334 : f32 to vector<1x128xf32>
    %339 = arith.addf %338, %337 : vector<1x128xf32>
    %c79 = arith.constant 79 : index
    %340 = memref.load %arg1[%c79] : memref<90xf32, #tpu.memory_space<smem>>
    %341 = vector.broadcast %340 : f32 to vector<1x128xf32>
    %342 = arith.mulf %341, %177 : vector<1x128xf32>
    %343 = arith.addf %339, %342 : vector<1x128xf32>
    %c80 = arith.constant 80 : index
    %344 = memref.load %arg1[%c80] : memref<90xf32, #tpu.memory_space<smem>>
    %345 = vector.broadcast %344 : f32 to vector<1x128xf32>
    %346 = arith.mulf %345, %201 : vector<1x128xf32>
    %347 = arith.addf %343, %346 : vector<1x128xf32>
    %c81 = arith.constant 81 : index
    %348 = memref.load %arg1[%c81] : memref<90xf32, #tpu.memory_space<smem>>
    %349 = vector.broadcast %348 : f32 to vector<1x128xf32>
    %350 = arith.mulf %349, %225 : vector<1x128xf32>
    %351 = arith.addf %347, %350 : vector<1x128xf32>
    %c82 = arith.constant 82 : index
    %352 = memref.load %arg1[%c82] : memref<90xf32, #tpu.memory_space<smem>>
    %353 = vector.broadcast %352 : f32 to vector<1x128xf32>
    %354 = arith.mulf %353, %249 : vector<1x128xf32>
    %355 = arith.addf %351, %354 : vector<1x128xf32>
    %cst_30 = arith.constant 0.000000e+00 : f32
    %356 = vector.broadcast %cst_30 : f32 to vector<1x128xf32>
    %357 = arith.subf %356, %355 : vector<1x128xf32>
    %358 = math.exp %357 : vector<1x128xf32>
    %cst_31 = arith.constant 1.000000e+00 : f32
    %359 = vector.broadcast %cst_31 : f32 to vector<1x128xf32>
    %360 = arith.addf %359, %358 : vector<1x128xf32>
    %361 = tpu.reciprocal %360 {approx = true} : vector<1x128xf32> -> vector<1x128xf32>
    %c89 = arith.constant 89 : index
    %362 = memref.load %arg1[%c89] : memref<90xf32, #tpu.memory_space<smem>>
    %c84 = arith.constant 84 : index
    %363 = memref.load %arg1[%c84] : memref<90xf32, #tpu.memory_space<smem>>
    %364 = vector.broadcast %363 : f32 to vector<1x128xf32>
    %365 = arith.mulf %364, %153 : vector<1x128xf32>
    %366 = vector.broadcast %362 : f32 to vector<1x128xf32>
    %367 = arith.addf %366, %365 : vector<1x128xf32>
    %c85 = arith.constant 85 : index
    %368 = memref.load %arg1[%c85] : memref<90xf32, #tpu.memory_space<smem>>
    %369 = vector.broadcast %368 : f32 to vector<1x128xf32>
    %370 = arith.mulf %369, %177 : vector<1x128xf32>
    %371 = arith.addf %367, %370 : vector<1x128xf32>
    %c86 = arith.constant 86 : index
    %372 = memref.load %arg1[%c86] : memref<90xf32, #tpu.memory_space<smem>>
    %373 = vector.broadcast %372 : f32 to vector<1x128xf32>
    %374 = arith.mulf %373, %201 : vector<1x128xf32>
    %375 = arith.addf %371, %374 : vector<1x128xf32>
    %c87 = arith.constant 87 : index
    %376 = memref.load %arg1[%c87] : memref<90xf32, #tpu.memory_space<smem>>
    %377 = vector.broadcast %376 : f32 to vector<1x128xf32>
    %378 = arith.mulf %377, %225 : vector<1x128xf32>
    %379 = arith.addf %375, %378 : vector<1x128xf32>
    %c88 = arith.constant 88 : index
    %380 = memref.load %arg1[%c88] : memref<90xf32, #tpu.memory_space<smem>>
    %381 = vector.broadcast %380 : f32 to vector<1x128xf32>
    %382 = arith.mulf %381, %249 : vector<1x128xf32>
    %383 = arith.addf %379, %382 : vector<1x128xf32>
    %cst_32 = arith.constant 0.000000e+00 : f32
    %384 = vector.broadcast %cst_32 : f32 to vector<1x128xf32>
    %385 = arith.subf %384, %383 : vector<1x128xf32>
    %386 = math.exp %385 : vector<1x128xf32>
    %cst_33 = arith.constant 1.000000e+00 : f32
    %387 = vector.broadcast %cst_33 : f32 to vector<1x128xf32>
    %388 = arith.addf %387, %386 : vector<1x128xf32>
    %389 = tpu.reciprocal %388 {approx = true} : vector<1x128xf32> -> vector<1x128xf32>
    %c0_34 = arith.constant 0 : index
    %c0_35 = arith.constant 0 : index
    %c0_36 = arith.constant 0 : index
    %390 = vector.load %arg3[%c0_34, %c0_35, %c0_36] : memref<5x1x128xf32, #tpu.memory_space<vmem>>, vector<1x1x128xf32>
    %391 = vector.shape_cast %390 : vector<1x1x128xf32> to vector<1x128xf32>
    %392 = vector.shape_cast %277 : vector<1x128xf32> to vector<1x1x128xf32>
    tpu.vector_store %arg3[%c0_34, %c0_35, %c0_36], %392 {strides = array<i32>} : memref<5x1x128xf32, #tpu.memory_space<vmem>>, vector<1x1x128xf32>,
    %c1_37 = arith.constant 1 : index
    %c0_38 = arith.constant 0 : index
    %c0_39 = arith.constant 0 : index
    %393 = vector.load %arg3[%c1_37, %c0_38, %c0_39] : memref<5x1x128xf32, #tpu.memory_space<vmem>>, vector<1x1x128xf32>
    %394 = vector.shape_cast %393 : vector<1x1x128xf32> to vector<1x128xf32>
    %395 = vector.shape_cast %305 : vector<1x128xf32> to vector<1x1x128xf32>
    tpu.vector_store %arg3[%c1_37, %c0_38, %c0_39], %395 {strides = array<i32>} : memref<5x1x128xf32, #tpu.memory_space<vmem>>, vector<1x1x128xf32>,
    %c2_40 = arith.constant 2 : index
    %c0_41 = arith.constant 0 : index
    %c0_42 = arith.constant 0 : index
    %396 = vector.load %arg3[%c2_40, %c0_41, %c0_42] : memref<5x1x128xf32, #tpu.memory_space<vmem>>, vector<1x1x128xf32>
    %397 = vector.shape_cast %396 : vector<1x1x128xf32> to vector<1x128xf32>
    %398 = vector.shape_cast %333 : vector<1x128xf32> to vector<1x1x128xf32>
    tpu.vector_store %arg3[%c2_40, %c0_41, %c0_42], %398 {strides = array<i32>} : memref<5x1x128xf32, #tpu.memory_space<vmem>>, vector<1x1x128xf32>,
    %c3_43 = arith.constant 3 : index
    %c0_44 = arith.constant 0 : index
    %c0_45 = arith.constant 0 : index
    %399 = vector.load %arg3[%c3_43, %c0_44, %c0_45] : memref<5x1x128xf32, #tpu.memory_space<vmem>>, vector<1x1x128xf32>
    %400 = vector.shape_cast %399 : vector<1x1x128xf32> to vector<1x128xf32>
    %401 = vector.shape_cast %361 : vector<1x128xf32> to vector<1x1x128xf32>
    tpu.vector_store %arg3[%c3_43, %c0_44, %c0_45], %401 {strides = array<i32>} : memref<5x1x128xf32, #tpu.memory_space<vmem>>, vector<1x1x128xf32>,
    %c4_46 = arith.constant 4 : index
    %c0_47 = arith.constant 0 : index
    %c0_48 = arith.constant 0 : index
    %402 = vector.load %arg3[%c4_46, %c0_47, %c0_48] : memref<5x1x128xf32, #tpu.memory_space<vmem>>, vector<1x1x128xf32>
    %403 = vector.shape_cast %402 : vector<1x1x128xf32> to vector<1x128xf32>
    %404 = vector.shape_cast %389 : vector<1x128xf32> to vector<1x1x128xf32>
    tpu.vector_store %arg3[%c4_46, %c0_47, %c0_48], %404 {strides = array<i32>} : memref<5x1x128xf32, #tpu.memory_space<vmem>>, vector<1x1x128xf32>,
    return
  }
  func.func @transform_0(%arg0: i32) -> i32 {
    %c0_i32 = arith.constant 0 : i32
    %c0_i32_0 = arith.constant 0 : i32
    return %c0_i32 : i32
  }
  func.func @transform_1(%arg0: i32) -> (i32, i32, i32) {
    %c0_i32 = arith.constant 0 : i32
    %c0_i32_0 = arith.constant 0 : i32
    %c0_i32_1 = arith.constant 0 : i32
    return %c0_i32, %arg0, %c0_i32_0 : i32, i32, i32
  }
  func.func @transform_2(%arg0: i32) -> (i32, i32, i32) {
    %c0_i32 = arith.constant 0 : i32
    %c0_i32_0 = arith.constant 0 : i32
    %c0_i32_1 = arith.constant 0 : i32
    return %c0_i32, %arg0, %c0_i32_0 : i32, i32, i32
  }
}

</mosaic_0001>

<bundles_post_ra>
// kernel: tpu_custom_call.1
= control target key start
LH: loop header
LB: loop body
LE: loop exit
PB: predicated region body
PF: predicated region fallthrough
CT: control target
= control target key end

     0   :  { %7 = vsyncpa [#allocation5], 0  ;;  %s890_s0 = inlined_call_operand.hbm [shape: f32[90], index: 0, kind: input, shape index: {}]   ;;  %s891_s1 = inlined_call_operand.hbm [shape: f32[5,1,128], index: 1, kind: input, shape index: {}]   ;;  %s892_s2 = inlined_call_operand.hbm [shape: f32[5,1,128], index: 2, kind: output, shape index: {}]  }
   0x1   :  { %8 = vsyncpa [#allocation3], 0 }
   0x2   :  { %9 = vsyncpa [#allocation4], 0  ;;  %s606_s9 = smov [#allocation2]   ;;  %s607_s12 = smov [#allocation6]  }
   0x3   :  { %17 = dma.hbm_to_smem %s890_s0, 16, %s606_s9, [#allocation5]  }
   0x4   :  { %s23_s13 = sshll.u32 %s607_s12, 4  ;;  %s24_s13 = int_to_ptr.vmem [resolvable:$true] %s23_s13 }
   0x5   :  { %s568_s14 = scalar_lea.vmem %s24_s13, 80  ;;  %s572_s15 = scalar_lea.vmem %s24_s13, 96 }
   0x6   :  { %p569_p0 = scmp.ne.s32.totalorder %s24_s13, %s568_s14  ;;  %p573_p1 = scmp.lt.s32.totalorder %s24_s13, %s24_s13 }
   0x7   :  { %p574_p2 = scmp.lt.s32.totalorder %s572_s15, %s568_s14 }
   0x9   :  { %p575_p3 = por %p574_p2, %p573_p1 }
   0xb   :  { %p576_p4 = pnand %p575_p3, %p569_p0 }
   0xd   :  { %579 = shalt.err (!%p576_p4)
}
   0xe   :  { %s608_s16 = smov 16   ;;  %s609_s17 = smov 1  }
   0xf   :  { %29 = dma.hbm_to_vmem [thread:$0]  %s891_s1, 80, %s24_s13, [#allocation3], %s608_s16, %s608_s16, %s609_s17  }
  0x10   :  { %600 = dma.done.wait [#allocation5], 16  }
  0x11   :  { %601 = vsyncadd [#allocation5], 4294967280 }
  0x12   :  { %602 = dma.done.wait [#allocation3], 80  }
  0x13   :  { %603 = vsyncadd [#allocation3], 4294967216 }
  0x14   :  { %36 = sfence }
  0x15   :  { %s438_s0 = sld [smem:[#allocation2 + $0x5]]  ;;  %v641_v0 = vld [vmem:[#allocation6] sm:$0x1]  ;;  %v650_v3 = vld [vmem:[#allocation6 + $0x1] sm:$0x1] }
  0x16   :  { %s47_s20 = sld [smem:[#allocation2]]  ;;  %v658_v12 = vld [vmem:[#allocation6 + $0x2] sm:$0x1]  ;;  %v671_v21 = vld [vmem:[#allocation6 + $0x3] sm:$0x1] }
  0x17   :  { %s439_s21 = sld [smem:[#allocation2 + $0x1]]  ;;  %v686_v33 = vld [vmem:[#allocation6 + $0x4] sm:$0x1] }
  0x18   :  { %s635_s22 = sld [smem:[#allocation2 + $0x2]] }
  0x19   :  { %s637_s23 = sld [smem:[#allocation2 + $0x3]] }
  0x1a   :  { %s639_s24 = sld [smem:[#allocation2 + $0x4]] }
  0x1b   :  { %s443_s25 = sld [smem:[#allocation2 + $0xb]]  ;;  %v50_v4 = vstv %s438_s0 }
  0x1c   :  { %s444_s26 = sld [smem:[#allocation2 + $0x6]]  ;;  %v48_v1 = vstv %s47_s20 }
  0x1d   :  { %s445_s1 = sld [smem:[#allocation2 + $0x7]]  ;;  %v49_v2 = vmul.f32 %v48_v1, %v641_v0  ;;  %v53_v5 = vstv %s439_s21 }
  0x1e   :  { %s643_s27 = sld [smem:[#allocation2 + $0x8]]  ;;  %v54_v11 = vmul.f32 %v53_v5, %v650_v3  ;;  %v57_v13 = vstv %s635_s22 }
  0x1f   :  { %s645_s28 = sld [smem:[#allocation2 + $0x9]]  ;;  %v51_v10 = vadd.f32 %v50_v4, %v49_v2  ;;  %v58_v18 = vmul.f32 %v57_v13, %v658_v12  ;;  %v61_v22 = vstv %s637_s23 }
  0x20   :  { %s648_s29 = sld [smem:[#allocation2 + $0xa]]  ;;  %v62_v32 = vmul.f32 %v61_v22, %v671_v21  ;;  %v65_v34 = vstv %s639_s24 }
  0x21   :  { %s652_s30 = sld [smem:[#allocation2 + $0x11]]  ;;  %v73_v8 = vstv %s443_s25  ;;  %v55_v17 = vadd.f32 %v54_v11, %v51_v10  ;;  %v66_v46 = vmul.f32 %v65_v34, %v686_v33 }
  0x22   :  { %v71_v6 = vstv %s444_s26  ;;  %s450_s3 = sld [smem:[#allocation2 + $0xc]] }
  0x23   :  { %v72_v7 = vmul.f32 %v71_v6, %v641_v0  ;;  %v76_v9 = vstv %s445_s1  ;;  %s451_s4 = sld [smem:[#allocation2 + $0xd]]  ;;  %v59_v31 = vadd.f32 %v58_v18, %v55_v17 }
  0x24   :  { %s656_s5 = sld [smem:[#allocation2 + $0xe]]  ;;  %v77_v15 = vmul.f32 %v76_v9, %v650_v3  ;;  %v80_v16 = vstv %s643_s27 }
  0x25   :  { %s661_s6 = sld [smem:[#allocation2 + $0xf]]  ;;  %v74_v14 = vadd.f32 %v73_v8, %v72_v7  ;;  %v81_v26 = vmul.f32 %v80_v16, %v658_v12  ;;  %v84_v27 = vstv %s645_s28  ;;  %v63_v45 = vadd.f32 %v62_v32, %v59_v31 }
  0x26   :  { %s664_s7 = sld [smem:[#allocation2 + $0x10]]  ;;  %v85_v35 = vmul.f32 %v84_v27, %v671_v21  ;;  %v88_v36 = vstv %s648_s29 }
  0x27   :  { %s667_s8 = sld [smem:[#allocation2 + $0x17]]  ;;  %v96_v20 = vstv %s652_s30  ;;  %v78_v25 = vadd.f32 %v77_v15, %v74_v14  ;;  %v89_v51 = vmul.f32 %v88_v36, %v686_v33  ;;  %v67_v57 = vadd.f32 %v66_v46, %v63_v45 }
  0x28   :  { %v94_v19 = vstv %s450_s3  ;;  %s456_s9 = sld [smem:[#allocation2 + $0x12]] }
  0x29   :  { %v95_v23 = vmul.f32 %v94_v19, %v641_v0  ;;  %v99_v24 = vstv %s451_s4  ;;  %s457_s10 = sld [smem:[#allocation2 + $0x13]]  ;;  %v82_v37 = vadd.f32 %v81_v26, %v78_v25 }
  0x2a   :  { %s677_s11 = sld [smem:[#allocation2 + $0x14]]  ;;  %v100_v29 = vmul.f32 %v99_v24, %v650_v3  ;;  %v103_v30 = vstv %s656_s5 }
  0x2b   :  { %v97_v28 = vadd.f32 %v96_v20, %v95_v23  ;;  %s681_s12 = sld [smem:[#allocation2 + $0x15]]  ;;  %v104_v38 = vmul.f32 %v103_v30, %v658_v12  ;;  %v107_v42 = vstv %s661_s6  ;;  %v86_v50 = vadd.f32 %v85_v35, %v82_v37 }
  0x2c   :  { %s684_s13 = sld [smem:[#allocation2 + $0x16]]  ;;  %v108_v52 = vmul.f32 %v107_v42, %v671_v21  ;;  %v111_v54 = vstv %s664_s7 }
  0x2d   :  { %s691_s14 = sld [smem:[#allocation2 + $0x1d]]  ;;  %v119_v40 = vstv %s667_s8  ;;  %v101_v41 = vadd.f32 %v100_v29, %v97_v28  ;;  %v90_v63 = vadd.f32 %v89_v51, %v86_v50  ;;  %v112_v1 = vmul.f32 %v111_v54, %v686_v33 }
  0x2e   :  { %v117_v39 = vstv %s456_s9  ;;  %s462_s15 = sld [smem:[#allocation2 + $0x18]] }
  0x2f   :  { %v118_v43 = vmul.f32 %v117_v39, %v641_v0  ;;  %v122_v44 = vstv %s457_s10  ;;  %s463_s18 = sld [smem:[#allocation2 + $0x19]]  ;;  %v105_v53 = vadd.f32 %v104_v38, %v101_v41  ;;  %v736_v13 = vmax.f32 %v90_v63, 0.0 }
  0x30   :  { %v123_v47 = vmul.f32 %v122_v44, %v650_v3  ;;  %v126_v48 = vstv %s677_s11  ;;  %s700_s19 = sld [smem:[#allocation2 + $0x1a]] }
  0x31   :  { %v120_v49 = vadd.f32 %v119_v40, %v118_v43  ;;  %s702_s0 = sld [smem:[#allocation2 + $0x1b]]  ;;  %v127_v56 = vmul.f32 %v126_v48, %v658_v12  ;;  %v130_v58 = vstv %s681_s12  ;;  %v109_v5 = vadd.f32 %v108_v52, %v105_v53 }
  0x32   :  { %s706_s20 = sld [smem:[#allocation2 + $0x1c]]  ;;  %v131_v7 = vmul.f32 %v130_v58, %v671_v21  ;;  %v134_v9 = vstv %s684_s13 }
  0x33   :  { %v124_v55 = vadd.f32 %v123_v47, %v120_v49  ;;  %s710_s21 = sld [smem:[#allocation2 + $0x23]]  ;;  %v142_v60 = vstv %s691_s14  ;;  %v113_v15 = vadd.f32 %v112_v1, %v109_v5  ;;  %v135_v17 = vmul.f32 %v134_v9, %v686_v33 }
  0x34   :  { %v140_v59 = vstv %s462_s15  ;;  %s714_s22 = sld [smem:[#allocation2 + $0x1e]] }
  0x35   :  { %v141_v61 = vmul.f32 %v140_v59, %v641_v0  ;;  %v145_v62 = vstv %s463_s18  ;;  %s717_s23 = sld [smem:[#allocation2 + $0x1f]]  ;;  %v128_v6 = vadd.f32 %v127_v56, %v124_v55  ;;  %v727_v0 = vmax.f32 %v67_v57, 0.0 }
  0x36   :  { %v146_v2 = vmul.f32 %v145_v62, %v650_v3  ;;  %v149_v4 = vstv %s700_s19  ;;  %s722_s24 = sld [smem:[#allocation2 + $0x20]]  ;;  %v751_v24 = vmax.f32 %v113_v15, 0.0 }
  0x37   :  { %v143_v8 = vadd.f32 %v142_v60, %v141_v61  ;;  %s725_s25 = sld [smem:[#allocation2 + $0x21]]  ;;  %v150_v10 = vmul.f32 %v149_v4, %v658_v12  ;;  %v153_v11 = vstv %s702_s0  ;;  %v132_v16 = vadd.f32 %v131_v7, %v128_v6 }
  0x38   :  { %s732_s26 = sld [smem:[#allocation2 + $0x22]]  ;;  %v154_v18 = vmul.f32 %v153_v11, %v671_v21  ;;  %v157_v19 = vstv %s706_s20 }
  0x39   :  { %v147_v3 = vadd.f32 %v146_v2, %v143_v8  ;;  %s734_s1 = sld [smem:[#allocation2 + $0x29]]  ;;  %v165_v23 = vstv %s710_s21  ;;  %v136_v25 = vadd.f32 %v135_v17, %v132_v16  ;;  %v158_v21 = vmul.f32 %v157_v19, %v686_v33 }
  0x3a   :  { %v163_v14 = vstv %s714_s22  ;;  %s474_s27 = sld [smem:[#allocation2 + $0x24]] }
  0x3b   :  { %s475_s28 = sld [smem:[#allocation2 + $0x25]]  ;;  %v151_v12 = vadd.f32 %v150_v10, %v147_v3  ;;  %v164_v20 = vmul.f32 %v163_v14, %v727_v0  ;;  %v168_v22 = vstv %s717_s23  ;;  %v761_v33 = vmax.f32 %v136_v25, 0.0 }
  0x3c   :  { %s744_s29 = sld [smem:[#allocation2 + $0x26]]  ;;  %v169_v26 = vmul.f32 %v168_v22, %v736_v13  ;;  %v172_v31 = vstv %s722_s24 }
  0x3d   :  { %s747_s30 = sld [smem:[#allocation2 + $0x27]]  ;;  %v155_v27 = vadd.f32 %v154_v18, %v151_v12  ;;  %v166_v28 = vadd.f32 %v165_v23, %v164_v20  ;;  %v173_v40 = vmul.f32 %v172_v31, %v751_v24  ;;  %v176_v41 = vstv %s725_s25 }
  0x3e   :  { %s749_s3 = sld [smem:[#allocation2 + $0x28]]  ;;  %v177_v46 = vmul.f32 %v176_v41, %v761_v33  ;;  %v180_v54 = vstv %s732_s26 }
  0x3f   :  { %s755_s4 = sld [smem:[#allocation2 + $0x2f]]  ;;  %v188_v30 = vstv %s734_s1  ;;  %v159_v38 = vadd.f32 %v158_v21, %v155_v27  ;;  %v170_v39 = vadd.f32 %v169_v26, %v166_v28 }
  0x40   :  { %v186_v29 = vstv %s474_s27  ;;  %s480_s5 = sld [smem:[#allocation2 + $0x2a]] }
  0x41   :  { %v187_v32 = vmul.f32 %v186_v29, %v727_v0  ;;  %v191_v34 = vstv %s475_s28  ;;  %s481_s6 = sld [smem:[#allocation2 + $0x2b]]  ;;  %v781_v50 = vmax.f32 %v159_v38, 0.0  ;;  %v174_v51 = vadd.f32 %v173_v40, %v170_v39 }
  0x42   :  { %v192_v35 = vmul.f32 %v191_v34, %v736_v13  ;;  %s482_s7 = sld [smem:[#allocation2 + $0x2c]]  ;;  %v195_v37 = vstv %s744_s29 }
  0x43   :  { %v189_v36 = vadd.f32 %v188_v30, %v187_v32  ;;  %s764_s8 = sld [smem:[#allocation2 + $0x2d]]  ;;  %v196_v43 = vmul.f32 %v195_v37, %v751_v24  ;;  %v199_v47 = vstv %s747_s30  ;;  %v178_v1 = vadd.f32 %v177_v46, %v174_v51 }
  0x44   :  { %s768_s9 = sld [smem:[#allocation2 + $0x2e]]  ;;  %v200_v59 = vmul.f32 %v199_v47, %v761_v33  ;;  %v203_v60 = vstv %s749_s3  ;;  %v181_v2 = vmul.f32 %v180_v54, %v781_v50 }
  0x45   :  { %s770_s10 = sld [smem:[#allocation2 + $0x35]]  ;;  %v193_v42 = vadd.f32 %v192_v35, %v189_v36  ;;  %v211_v45 = vstv %s755_s4  ;;  %v204_v6 = vmul.f32 %v203_v60, %v781_v50 }
  0x46   :  { %v209_v44 = vstv %s480_s5  ;;  %s774_s11 = sld [smem:[#allocation2 + $0x30]]  ;;  %v182_v12 = vadd.f32 %v181_v2, %v178_v1 }
  0x47   :  { %v210_v48 = vmul.f32 %v209_v44, %v727_v0  ;;  %v214_v49 = vstv %s481_s6  ;;  %s779_s12 = sld [smem:[#allocation2 + $0x31]]  ;;  %v197_v58 = vadd.f32 %v196_v43, %v193_v42 }
  0x48   :  { %v215_v52 = vmul.f32 %v214_v49, %v736_v13  ;;  %v218_v53 = vstv %s482_s7  ;;  %s784_s13 = sld [smem:[#allocation2 + $0x32]]  ;;  %v821_v31 = vmax.f32 %v182_v12, 0.0 }
  0x49   :  { %v212_v55 = vadd.f32 %v211_v45, %v210_v48  ;;  %v219_v56 = vmul.f32 %v218_v53, %v751_v24  ;;  %v222_v57 = vstv %s764_s8  ;;  %s789_s14 = sld [smem:[#allocation2 + $0x33]]  ;;  %v201_v10 = vadd.f32 %v200_v59, %v197_v58 }
  0x4a   :  { %s793_s15 = sld [smem:[#allocation2 + $0x34]]  ;;  %v223_v62 = vmul.f32 %v222_v57, %v761_v33  ;;  %v226_v63 = vstv %s768_s9 }
  0x4b   :  { %v216_v61 = vadd.f32 %v215_v52, %v212_v55  ;;  %s797_s18 = sld [smem:[#allocation2 + $0x3b]]  ;;  %v234_v5 = vstv %s770_s10  ;;  %v227_v11 = vmul.f32 %v226_v63, %v781_v50  ;;  %v205_v23 = vadd.f32 %v204_v6, %v201_v10 }
  0x4c   :  { %v232_v4 = vstv %s774_s11  ;;  %s492_s19 = sld [smem:[#allocation2 + $0x36]] }
  0x4d   :  { %v220_v7 = vadd.f32 %v219_v56, %v216_v61  ;;  %v233_v8 = vmul.f32 %v232_v4, %v727_v0  ;;  %v237_v9 = vstv %s779_s12  ;;  %s493_s0 = sld [smem:[#allocation2 + $0x37]]  ;;  %v826_v39 = vmax.f32 %v205_v23, 0.0 }
  0x4e   :  { %v238_v3 = vmul.f32 %v237_v9, %v736_v13  ;;  %v241_v14 = vstv %s784_s13  ;;  %s494_s20 = sld [smem:[#allocation2 + $0x38]] }
  0x4f   :  { %v224_v15 = vadd.f32 %v223_v62, %v220_v7  ;;  %v235_v16 = vadd.f32 %v234_v5, %v233_v8  ;;  %v242_v17 = vmul.f32 %v241_v14, %v751_v24  ;;  %v245_v18 = vstv %s789_s14  ;;  %s810_s21 = sld [smem:[#allocation2 + $0x39]] }
  0x50   :  { %v249_v19 = vstv %s793_s15  ;;  %s813_s22 = sld [smem:[#allocation2 + $0x3a]]  ;;  %v246_v22 = vmul.f32 %v245_v18, %v761_v33 }
  0x51   :  { %v239_v20 = vadd.f32 %v238_v3, %v235_v16  ;;  %s816_s23 = sld [smem:[#allocation2 + $0x41]]  ;;  %v228_v25 = vadd.f32 %v227_v11, %v224_v15  ;;  %v257_v26 = vstv %s797_s18  ;;  %v250_v28 = vmul.f32 %v249_v19, %v781_v50 }
  0x52   :  { %v255_v21 = vstv %s492_s19  ;;  %s498_s24 = sld [smem:[#allocation2 + $0x3c]] }
  0x53   :  { %v243_v27 = vadd.f32 %v242_v17, %v239_v20  ;;  %v256_v29 = vmul.f32 %v255_v21, %v727_v0  ;;  %v260_v30 = vstv %s493_s0  ;;  %s499_s25 = sld [smem:[#allocation2 + $0x3d]]  ;;  %v831_v0 = vmax.f32 %v228_v25, 0.0 }
  0x54   :  { %v261_v32 = vmul.f32 %v260_v30, %v736_v13  ;;  %v264_v34 = vstv %s494_s20  ;;  %s500_s26 = sld [smem:[#allocation2 + $0x3e]] }
  0x55   :  { %v247_v35 = vadd.f32 %v246_v22, %v243_v27  ;;  %v258_v36 = vadd.f32 %v257_v26, %v256_v29  ;;  %v265_v37 = vmul.f32 %v264_v34, %v751_v24  ;;  %v268_v38 = vstv %s810_s21  ;;  %s501_s1 = sld [smem:[#allocation2 + $0x3f]] }
  0x56   :  { %v272_v40 = vstv %s813_s22  ;;  %s829_s27 = sld [smem:[#allocation2 + $0x40]]  ;;  %v269_v13 = vmul.f32 %v268_v38, %v761_v33 }
  0x57   :  { %v251_v41 = vadd.f32 %v250_v28, %v247_v35  ;;  %v262_v42 = vadd.f32 %v261_v32, %v258_v36  ;;  %s834_s28 = sld [smem:[#allocation2 + $0x47]]  ;;  %v273_v43 = vmul.f32 %v272_v40, %v781_v50  ;;  %v280_v45 = vstv %s816_s23 }
  0x58   :  { %v278_v44 = vstv %s498_s24  ;;  %s504_s29 = sld [smem:[#allocation2 + $0x42]] }
  0x59   :  { %v838_v24 = vmax.f32 %v251_v41, 0.0  ;;  %v266_v46 = vadd.f32 %v265_v37, %v262_v42  ;;  %v279_v47 = vmul.f32 %v278_v44, %v821_v31  ;;  %v283_v48 = vstv %s499_s25  ;;  %s505_s30 = sld [smem:[#allocation2 + $0x43]]  ;;  %s610_s25 = smov [#allocation7]  }
  0x5a   :  { %v284_v49 = vmul.f32 %v283_v48, %v826_v39  ;;  %v287_v51 = vstv %s500_s26  ;;  %s506_s3 = sld [smem:[#allocation2 + $0x44]]  ;;  %s425_s26 = sshll.u32 %s610_s25, 4  ;;  %s426_s26 = int_to_ptr.vmem [resolvable:$true] %s425_s26 }
  0x5b   :  { %v270_v33 = vadd.f32 %v269_v13, %v266_v46  ;;  %v281_v52 = vadd.f32 %v280_v45, %v279_v47  ;;  %v288_v50 = vmul.f32 %v287_v51, %v831_v0  ;;  %v291_v53 = vstv %s501_s1  ;;  %s507_s4 = sld [smem:[#allocation2 + $0x45]]  ;;  %s580_s1 = scalar_lea.vmem %s426_s26, 80 }
  0x5c   :  { %s508_s5 = sld [smem:[#allocation2 + $0x46]]  ;;  %v292_v56 = vmul.f32 %v291_v53, %v838_v24  ;;  %v295_v57 = vstv %s829_s27  ;;  %p581_p5 = scmp.ne.s32.totalorder %s426_s26, %s580_s1 }
  0x5d   :  { %v274_v54 = vadd.f32 %v273_v43, %v270_v33  ;;  %v285_v55 = vadd.f32 %v284_v49, %v281_v52  ;;  %s844_s6 = sld [smem:[#allocation2 + $0x4d]]  ;;  %v307_v59 = vstv %s834_s28  ;;  %s584_s27 = scalar_lea.vmem %s426_s26, 96 }
  0x5e   :  { %v305_v58 = vstv %s504_s29  ;;  %s510_s7 = sld [smem:[#allocation2 + $0x48]]  ;;  %p585_p6 = scmp.lt.s32.totalorder %s426_s26, %s426_s26 }
  0x5f   :  { %v848_v60 = vmax.f32 %v274_v54, 0.0  ;;  %v289_v61 = vadd.f32 %v288_v50, %v285_v55  ;;  %v306_v62 = vmul.f32 %v305_v58, %v821_v31  ;;  %v310_v63 = vstv %s505_s30  ;;  %s511_s8 = sld [smem:[#allocation2 + $0x49]]  ;;  %p586_p7 = scmp.lt.s32.totalorder %s584_s27, %s580_s1 }
  0x60   :  { %v311_v1 = vmul.f32 %v310_v63, %v826_v39  ;;  %v314_v2 = vstv %s506_s3  ;;  %s512_s9 = sld [smem:[#allocation2 + $0x4a]] }
  0x61   :  { %v293_v4 = vadd.f32 %v292_v56, %v289_v61  ;;  %v296_v5 = vmul.f32 %v295_v57, %v848_v60  ;;  %v308_v6 = vadd.f32 %v307_v59, %v306_v62  ;;  %v315_v7 = vmul.f32 %v314_v2, %v831_v0  ;;  %s854_s10 = sld [smem:[#allocation2 + $0x4b]]  ;;  %p587_p8 = por %p586_p7, %p585_p6 }
  0x62   :  { %v318_v8 = vstv %s507_s4  ;;  %v322_v9 = vstv %s508_s5  ;;  %s514_s11 = sld [smem:[#allocation2 + $0x4c]] }
  0x63   :  { %v297_v10 = vadd.f32 %v296_v5, %v293_v4  ;;  %v312_v11 = vadd.f32 %v311_v1, %v308_v6  ;;  %v319_v3 = vmul.f32 %v318_v8, %v838_v24  ;;  %s857_s12 = sld [smem:[#allocation2 + $0x53]]  ;;  %v323_v14 = vmul.f32 %v322_v9, %v848_v60  ;;  %p588_p9 = pnand %p587_p8, %p581_p5 }
  0x64   :  { %v332_v15 = vstv %s510_s7  ;;  %v334_v16 = vstv %s844_s6  ;;  %s516_s13 = sld [smem:[#allocation2 + $0x4e]] }
  0x65   :  { %v298_v17 = vsub.f32 0.0, %v297_v10  ;;  %v316_v18 = vadd.f32 %v315_v7, %v312_v11  ;;  %v333_v12 = vmul.f32 %v332_v15, %v821_v31  ;;  %v337_v19 = vstv %s511_s8  ;;  %s517_s14 = sld [smem:[#allocation2 + $0x4f]] }
  0x66   :  { %v338_v20 = vmul.f32 %v337_v19, %v826_v39  ;;  %v341_v22 = vstv %s512_s9  ;;  %s518_s15 = sld [smem:[#allocation2 + $0x50]] }
  0x67   :  { %v299_v23 = vmul.f32 1.442695, %v298_v17  ;;  %v320_v25 = vadd.f32 %v319_v3, %v316_v18  ;;  %v335_v21 = vadd.f32 %v334_v16, %v333_v12  ;;  %v342_v26 = vmul.f32 %v341_v22, %v831_v0  ;;  %s864_s18 = sld [smem:[#allocation2 + $0x51]] }
  0x68   :  { %v345_v27 = vstv %s854_s10  ;;  %v349_v28 = vstv %s514_s11  ;;  %s520_s19 = sld [smem:[#allocation2 + $0x52]] }
  0x69   :  { %532 = vpow2.f32 %v299_v23  ;;  %v324_v29 = vadd.f32 %v323_v14, %v320_v25  ;;  %v339_v30 = vadd.f32 %v338_v20, %v335_v21  ;;  %v346_v32 = vmul.f32 %v345_v27, %v838_v24  ;;  %s868_s0 = sld [smem:[#allocation2 + $0x59]] }
  0x6a   :  { %v350_v34 = vmul.f32 %v349_v28, %v848_v60  ;;  %v359_v35 = vstv %s516_s13  ;;  %v361_v36 = vstv %s857_s12  ;;  %s522_s20 = sld [smem:[#allocation2 + $0x54]] }
  0x6b   :  { %v325_v37 = vsub.f32 0.0, %v324_v29  ;;  %v343_v38 = vadd.f32 %v342_v26, %v339_v30  ;;  %v360_v40 = vmul.f32 %v359_v35, %v821_v31  ;;  %v364_v41 = vstv %s517_s14  ;;  %s523_s21 = sld [smem:[#allocation2 + $0x55]] }
  0x6c   :  { %v365_v42 = vmul.f32 %v364_v41, %v826_v39  ;;  %v368_v13 = vstv %s518_s15  ;;  %s524_s22 = sld [smem:[#allocation2 + $0x56]] }
  0x6d   :  { %v326_v43 = vmul.f32 1.442695, %v325_v37  ;;  %v347_v44 = vadd.f32 %v346_v32, %v343_v38  ;;  %v362_v45 = vadd.f32 %v361_v36, %v360_v40  ;;  %v369_v46 = vmul.f32 %v368_v13, %v831_v0  ;;  %s525_s23 = sld [smem:[#allocation2 + $0x57]] }
  0x6e   :  { %v372_v47 = vstv %s864_s18  ;;  %v376_v48 = vstv %s520_s19  ;;  %s526_s24 = sld [smem:[#allocation2 + $0x58]] }
  0x6f   :  { %534 = vpow2.f32 %v326_v43  ;;  %v351_v49 = vadd.f32 %v350_v34, %v347_v44  ;;  %v366_v51 = vadd.f32 %v365_v42, %v362_v45  ;;  %v373_v33 = vmul.f32 %v372_v47, %v838_v24 }
  0x70   :  { %v377_v52 = vmul.f32 %v376_v48, %v848_v60  ;;  %v386_v50 = vstv %s522_s20  ;;  %v388_v53 = vstv %s868_s0 }
  0x71   :  { %v352_v54 = vsub.f32 0.0, %v351_v49  ;;  %v370_v55 = vadd.f32 %v369_v46, %v366_v51  ;;  %v387_v56 = vmul.f32 %v386_v50, %v821_v31  ;;  %v391_v57 = vstv %s523_s21 }
  0x72   :  { %v392_v58 = vmul.f32 %v391_v57, %v826_v39  ;;  %v395_v59 = vstv %s524_s22 }
  0x73   :  { %v353_v61 = vmul.f32 1.442695, %v352_v54  ;;  %v374_v62 = vadd.f32 %v373_v33, %v370_v55  ;;  %v389_v63 = vadd.f32 %v388_v53, %v387_v56  ;;  %v396_v1 = vmul.f32 %v395_v59, %v831_v0 }
  0x74   :  { %v399_v2 = vstv %s525_s23  ;;  %v403_v4 = vstv %s526_s24 }
  0x75   :  { %536 = vpow2.f32 %v353_v61  ;;  %v378_v5 = vadd.f32 %v377_v52, %v374_v62  ;;  %v393_v6 = vadd.f32 %v392_v58, %v389_v63  ;;  %v400_v7 = vmul.f32 %v399_v2, %v838_v24 }
  0x76   :  { %v533_v8 = vpop.eup %532  ;;  %v404_v11 = vmul.f32 %v403_v4, %v848_v60 }
  0x77   :  { %v301_v9 = vadd.f32 1.0, %v533_v8  ;;  %v379_v10 = vsub.f32 0.0, %v378_v5  ;;  %v397_v31 = vadd.f32 %v396_v1, %v393_v6 }
  0x79   :  { %538 = vrcp.f32 %v301_v9  ;;  %v380_v39 = vmul.f32 1.442695, %v379_v10  ;;  %v401_v3 = vadd.f32 %v400_v7, %v397_v31 }
  0x7b   :  { %540 = vpow2.f32 %v380_v39  ;;  %v405_v14 = vadd.f32 %v404_v11, %v401_v3 }
  0x7c   :  { %v535_v15 = vpop.eup %534 }
  0x7d   :  { %v328_v0 = vadd.f32 1.0, %v535_v15  ;;  %v406_v16 = vsub.f32 0.0, %v405_v14 }
  0x7f   :  { %542 = vrcp.f32 %v328_v0  ;;  %v407_v17 = vmul.f32 1.442695, %v406_v16 }
  0x81   :  { %544 = vpow2.f32 %v407_v17 }
  0x82   :  { %v537_v18 = vpop.eup %536 }
  0x83   :  { %v355_v12 = vadd.f32 1.0, %v537_v18 }
  0x85   :  { %546 = vrcp.f32 %v355_v12 }
  0x86   :  { %v539_v24 = vpop.eup %538 }
  0x87   :  { %411 = vst [vmem:[#allocation7] sm:$0x1] %v539_v24 }
  0x88   :  { %v541_v19 = vpop.eup %540 }
  0x89   :  { %v382_v20 = vadd.f32 1.0, %v541_v19 }
  0x8b   :  { %548 = vrcp.f32 %v382_v20 }
  0x8c   :  { %v543_v60 = vpop.eup %542 }
  0x8d   :  { %413 = vst [vmem:[#allocation7 + $0x1] sm:$0x1] %v543_v60 }
  0x8e   :  { %v545_v22 = vpop.eup %544 }
  0x8f   :  { %v409_v23 = vadd.f32 1.0, %v545_v22 }
  0x91   :  { %550 = vrcp.f32 %v409_v23 }
  0x92   :  { %v547_v25 = vpop.eup %546 }
  0x93   :  { %415 = vst [vmem:[#allocation7 + $0x2] sm:$0x1] %v547_v25 }
  0x98   :  { %v549_v21 = vpop.eup %548 }
  0x99   :  { %417 = vst [vmem:[#allocation7 + $0x3] sm:$0x1] %v549_v21 }
  0x9e   :  { %v551_v26 = vpop.eup %550 }
  0x9f   :  { %419 = vst [vmem:[#allocation7 + $0x4] sm:$0x1] %v551_v26 }
  0xa0   :  { %591 = shalt.err (!%p588_p9)
}
  0xa1   :  { %431 = dma.vmem_to_hbm [thread:$0]  %s426_s26, 80, %s892_s2, [#allocation4], %s608_s16, %s608_s16, %s609_s17  }
  0xa2   :  { %604 = dma.done.wait [#allocation4], 80  }
  0xa3   :  { %605 = vsyncadd [#allocation4], 4294967216 }
  0xa4   :  { %435 = vsyncpa [#allocation3], 1 }
  0xa5   :  { %436 = vsyncpa [#allocation4], 1 }
  0xa6   :  { %437 = vsyncpa [#allocation5], 1 }

</bundles_post_ra>
